<compile_context>
chip_gen: v5e
topology: v5e:2x2
jax: 0.10.0
libtpu: 0.0.40
codegen_flags: <defaults>
</compile_context>

<pallas_src>
import functools
import math

import jax
import jax.numpy as jnp
import numpy as np
from jax.experimental import pallas as pl
from jax.experimental.pallas import tpu as pltpu

_NEG = -1e30  # effectively -inf for masked columns (NaN-safe in f32)


# ----------------------------------------------------------------------------
# Fused Pallas kernel: bf16 cosine matmul + scatter-mask + online LSE + CE
# Grid = (nc, nb): class tiles outer (streamed reduction), batch tiles inner.
# ----------------------------------------------------------------------------
def _fused_loss_kernel(tgt_ref, newt_ref, x_ref, w_ref, loss_ref,
                       m_sc, l_sc, *, num_classes):
    ci = pl.program_id(0)          # class-tile index (outer, reduction)
    bi = pl.program_id(1)          # batch-tile index (inner)
    nc = pl.num_programs(0)
    tb = x_ref.shape[0]

    @pl.when(ci == 0)
    def _():
        m_sc[bi] = jnp.full((tb, 1), _NEG, jnp.float32)
        l_sc[bi] = jnp.zeros((tb, 1), jnp.float32)

    # MXU: (tb, D) x (tc, D)^T -> (tb, tc), f32 accumulation.  Operands are
    # pre-normalized bf16 with s folded into x, so `z` IS the scaled logit.
    z = jax.lax.dot_general(
        x_ref[...], w_ref[...], (((1,), (1,)), ((), ())),
        preferred_element_type=jnp.float32)
    tc = z.shape[1]

    cols = ci * tc + jax.lax.broadcasted_iota(jnp.int32, (tb, tc), 1)
    # Mask (a) the target column (it is replaced by the margin-adjusted logit
    # at finalize — exactly torch's scatter_ semantics) and (b) class padding.
    drop = jnp.logical_or(cols == tgt_ref[...], cols >= num_classes)
    z = jnp.where(drop, _NEG, z)

    # Online log-sum-exp update for this batch tile.
    m_prev = m_sc[bi]
    m_new = jnp.maximum(m_prev, jnp.max(z, axis=1, keepdims=True))
    l_new = (l_sc[bi] * jnp.exp(m_prev - m_new)
             + jnp.sum(jnp.exp(z - m_new), axis=1, keepdims=True))
    m_sc[bi] = m_new
    l_sc[bi] = l_new

    @pl.when(ci == nc - 1)
    def _():
        new_t = newt_ref[...]                     # (tb, 1), s-scaled margin logit
        m_f = jnp.maximum(m_new, new_t)
        l_f = l_new * jnp.exp(m_new - m_f) + jnp.exp(new_t - m_f)
        # per-row cross entropy: logsumexp(new_logits) - new_logits[target]
        loss_ref[...] = m_f + jnp.log(l_f) - new_t


# ----------------------------------------------------------------------------
# Host-side glue (plain JAX, exact semantics of the PyTorch module)
# ----------------------------------------------------------------------------
def _smooth_arccos(x, eps=1e-6):
    """Smooth linear extension of arccos to all of R (matches the torch code)."""
    c = jnp.float32(1.0 - eps)
    d_c = -1.0 / jnp.sqrt(1.0 - c * c)            # arccos'(c) == arccos'(-c)
    out = jnp.arccos(jnp.clip(x, -c, c))
    out = jnp.where(x > c, jnp.arccos(c) + (x - c) * d_c, out)
    out = jnp.where(x < -c, jnp.arccos(-c) + (x + c) * d_c, out)
    return out


def _round_up(n, m):
    return (n + m - 1) // m * m


@functools.partial(jax.jit, static_argnames=("s", "m1", "m2", "m3", "eps"))
def angular_softmax_loss(embedding, W, target, *, s, m1=1.0, m2=0.0, m3=0.0, eps=1e-6):
    B, D = embedding.shape
    C, _ = W.shape
    x = embedding.astype(jnp.float32)
    w = W.astype(jnp.float32)
    tgt = target.astype(jnp.int32)

    # ---- O((B + C) * D) f32 preprocessing (fused by XLA under jit) ----------
    # F.normalize(..., p=2): v / max(||v||, 1e-12)  ->  keep reciprocals.
    inv_x = 1.0 / jnp.maximum(jnp.sqrt(jnp.sum(x * x, axis=1, keepdims=True)), 1e-12)  # (B,1)
    inv_w = 1.0 / jnp.maximum(jnp.sqrt(jnp.sum(w * w, axis=1, keepdims=True)), 1e-12)  # (C,1)

    # Target cosine + ArcFace margin transform in full f32 (arccos is the
    # numerically sensitive part); reads only B rows of W.
    w_tgt = jnp.take(w, tgt, axis=0)                                       # (B, D)
    cos_t = jnp.sum(x * w_tgt, axis=1, keepdims=True) * inv_x * jnp.take(inv_w, tgt, axis=0)
    theta = _smooth_arccos(cos_t, eps)
    new_t = (s * (jnp.cos(m1 * theta + m2) - m3)).astype(jnp.float32)      # (B,1), s-scaled

    # Fold normalization (and s) into the bf16 casts: unit-norm MXU operands,
    # no per-element scale multiplies inside the kernel.
    x_bf = (x * (inv_x * s)).astype(jnp.bfloat16)
    w_bf = (w * inv_w).astype(jnp.bfloat16)

    # ---- tiles & padding ------------------------------------------------------
    Dp = _round_up(D, 128)                         # MXU contraction dim (128-aligned)
    tc = 1024 if Dp <= 256 else 512                # big class tiles -> big W DMAs
    tc = min(tc, _round_up(C, 128))
    tb = max(8, min(_round_up(B, 8), (32 * 1024 // tc) // 8 * 8))  # cap tb*tc ~32K f32
    Bp, Cp = _round_up(B, tb), _round_up(C, tc)
    nb, nc = Bp // tb, Cp // tc

    x_bf = jnp.pad(x_bf, ((0, Bp - B), (0, Dp - D)))
    w_bf = jnp.pad(w_bf, ((0, Cp - C), (0, Dp - D)))
    tgt2d = jnp.pad(tgt.reshape(B, 1), ((0, Bp - B), (0, 0)))
    newt = jnp.pad(new_t, ((0, Bp - B), (0, 0)))

    # ---- fused kernel: class tiles OUTER (W streamed once), batch tiles inner -
    per_row = pl.pallas_call(
        functools.partial(_fused_loss_kernel, num_classes=C),
        out_shape=jax.ShapeDtypeStruct((Bp, 1), jnp.float32),
        grid_spec=pltpu.PrefetchScalarGridSpec(
            num_scalar_prefetch=0,
            grid=(nc, nb),
            in_specs=[
                pl.BlockSpec((tb, 1), lambda ci, bi: (bi, 0)),    # target ids
                pl.BlockSpec((tb, 1), lambda ci, bi: (bi, 0)),    # s-scaled margin logit
                pl.BlockSpec((tb, Dp), lambda ci, bi: (bi, 0)),   # normalized x (bf16, s folded)
                pl.BlockSpec((tc, Dp), lambda ci, bi: (ci, 0)),   # normalized W (bf16); block
                                                                  # index depends only on ci =>
                                                                  # one HBM fetch per class tile
            ],
            out_specs=pl.BlockSpec((tb, 1), lambda ci, bi: (bi, 0)),
            scratch_shapes=[
                pltpu.VMEM((nb, tb, 1), jnp.float32),   # running row max, per batch tile
                pltpu.VMEM((nb, tb, 1), jnp.float32),   # running row sum, per batch tile
            ],
        ),
        compiler_params=pltpu.CompilerParams(
            # Reduction axis is outermost on purpose (W streamed once); the tiny
            # (tb,1) loss block just gets rewritten on its final visit.
            # TODO(synk): on v7x, add a leading size-2 "parallel" batch split so
            # both TensorCores are busy (each then streams W, sharing HBM BW).
            dimension_semantics=("arbitrary", "arbitrary"),
            vmem_limit_bytes=32 * 1024 * 1024,
        ),
    )(tgt2d, newt, x_bf, w_bf)

    return jnp.mean(per_row[:B, 0])


# ----------------------------------------------------------------------------
# Pure-JAX reference (mirrors the PyTorch forward exactly, f32)
# ----------------------------------------------------------------------------
def reference_loss(embedding, W, target, *, s, m1=1.0, m2=0.0, m3=0.0, eps=1e-6):
    Wn = W / jnp.maximum(jnp.linalg.norm(W, axis=1, keepdims=True), 1e-12)
    xn = embedding / jnp.maximum(jnp.linalg.norm(embedding, axis=1, keepdims=True), 1e-12)
    logits = xn @ Wn.T
    lt = jnp.take_along_axis(logits, target[:, None], axis=1)
    lt = jnp.cos(m1 * _smooth_arccos(lt, eps) + m2) - m3
    onehot = jax.nn.one_hot(target, logits.shape[1], dtype=jnp.bool_)
    new_logits = s * jnp.where(onehot, lt, logits)
    logp = jax.nn.log_softmax(new_logits, axis=1)
    return -jnp.mean(jnp.take_along_axis(logp, target[:, None], axis=1))


# ----------------------------------------------------------------------------
if __name__ == "__main__":
    B, D, C = 8, 32, 16          # batch, embedding size, number of classes
    s_scale, m1, m2, m3 = 30.0, 1.0, 0.5, 0.0

    key = jax.random.PRNGKey(0)
    k_emb, k_w, k_tgt = jax.random.split(key, 3)

    embedding = jax.random.normal(k_emb, (B, D), dtype=jnp.float32)
    # kaiming_uniform_(a=sqrt(5)) on a (C, D) weight -> U(-1/sqrt(D), 1/sqrt(D))
    bound = 1.0 / math.sqrt(D)
    W = jax.random.uniform(k_w, (C, D), dtype=jnp.float32, minval=-bound, maxval=bound)
    target = jax.random.randint(k_tgt, (B,), 0, C, dtype=jnp.int32)

    loss = angular_softmax_loss(embedding, W, target, s=s_scale, m1=m1, m2=m2, m3=m3)
    loss = jax.block_until_ready(loss)

    loss_ref = reference_loss(embedding, W, target, s=s_scale, m1=m1, m2=m2, m3=m3)
    # bf16 MXU operands (unit-norm, f32 accumulation) vs f32 reference.
    np.testing.assert_allclose(np.asarray(loss), np.asarray(loss_ref), rtol=2e-2, atol=2e-2)

    print("KERNEL_OK")
</pallas_src>

<mosaic_0001>
module attributes {stable_mosaic.version = 11 : i64} {
  func.func @_fused_loss_kernel(%arg0: i32, %arg1: i32, %arg2: memref<8x1xi32, #tpu.memory_space<vmem>>, %arg3: memref<8x1xf32, #tpu.memory_space<vmem>>, %arg4: memref<8x128xbf16, #tpu.memory_space<vmem>>, %arg5: memref<128x128xbf16, #tpu.memory_space<vmem>>, %arg6: memref<8x1xf32, #tpu.memory_space<vmem>>, %arg7: memref<1x8x1xf32, #tpu.memory_space<vmem>>, %arg8: memref<1x8x1xf32, #tpu.memory_space<vmem>>) attributes {dimension_semantics = [#tpu.dimension_semantics<arbitrary>, #tpu.dimension_semantics<arbitrary>], iteration_bounds = array<i64: 1, 1>, scalar_prefetch = 0 : i64, scratch_operands = 2 : i64, tpu.core_type = #tpu.core_type<tc>, window_params = [{transform_indices = @transform_0, window_bounds = array<i64: 8, 1>}, {transform_indices = @transform_1, window_bounds = array<i64: 8, 1>}, {transform_indices = @transform_2, window_bounds = array<i64: 8, 128>}, {transform_indices = @transform_3, window_bounds = array<i64: 128, 128>}, {transform_indices = @transform_4, window_bounds = array<i64: 8, 1>}]} {
    %c0_i32 = arith.constant 0 : i32
    %0 = arith.cmpi eq, %arg0, %c0_i32 : i32
    %1 = arith.extui %0 : i1 to i32
    %c0_i32_0 = arith.constant 0 : i32
    %2 = arith.cmpi ne, %1, %c0_i32_0 : i32
    scf.if %2 {
      %cst_19 = arith.constant -1.000000e+30 : f32
      %47 = vector.broadcast %cst_19 : f32 to vector<8x1xf32>
      %48 = arith.index_cast %arg1 : i32 to index
      %c0_20 = arith.constant 0 : index
      %c0_21 = arith.constant 0 : index
      %49 = vector.load %arg7[%48, %c0_20, %c0_21] : memref<1x8x1xf32, #tpu.memory_space<vmem>>, vector<1x8x1xf32>
      %50 = vector.shape_cast %49 : vector<1x8x1xf32> to vector<8x1xf32>
      %51 = vector.shape_cast %47 : vector<8x1xf32> to vector<1x8x1xf32>
      tpu.vector_store %arg7[%48, %c0_20, %c0_21], %51 {strides = array<i32>} : memref<1x8x1xf32, #tpu.memory_space<vmem>>, vector<1x8x1xf32>,
      %cst_22 = arith.constant 0.000000e+00 : f32
      %52 = vector.broadcast %cst_22 : f32 to vector<8x1xf32>
      %53 = arith.index_cast %arg1 : i32 to index
      %c0_23 = arith.constant 0 : index
      %c0_24 = arith.constant 0 : index
      %54 = vector.load %arg8[%53, %c0_23, %c0_24] : memref<1x8x1xf32, #tpu.memory_space<vmem>>, vector<1x8x1xf32>
      %55 = vector.shape_cast %54 : vector<1x8x1xf32> to vector<8x1xf32>
      %56 = vector.shape_cast %52 : vector<8x1xf32> to vector<1x8x1xf32>
      tpu.vector_store %arg8[%53, %c0_23, %c0_24], %56 {strides = array<i32>} : memref<1x8x1xf32, #tpu.memory_space<vmem>>, vector<1x8x1xf32>,
    } else {
    }
    %c0 = arith.constant 0 : index
    %c0_1 = arith.constant 0 : index
    %3 = vector.load %arg4[%c0, %c0_1] : memref<8x128xbf16, #tpu.memory_space<vmem>>, vector<8x128xbf16>
    %c0_2 = arith.constant 0 : index
    %c0_3 = arith.constant 0 : index
    %4 = vector.load %arg5[%c0_2, %c0_3] : memref<128x128xbf16, #tpu.memory_space<vmem>>, vector<128x128xbf16>
    %cst = arith.constant dense<0.000000e+00> : vector<8x128xf32>
    %5 = tpu.matmul %3, %4, %cst {dimension_numbers = #tpu.dot_dimension_numbers<[1], [1], [0], [0], [0, 0, 1, 0], [], []>} : vector<8x128xbf16>, vector<128x128xbf16>, vector<8x128xf32> -> vector<8x128xf32>
    %c128_i32 = arith.constant 128 : i32
    %6 = arith.muli %arg0, %c128_i32 : i32
    %7 = tpu.iota {dimensions = array<i32: 1>} : vector<8x128xi32>
    %8 = vector.broadcast %6 : i32 to vector<8x128xi32>
    %9 = arith.addi %8, %7 : vector<8x128xi32>
    %c0_4 = arith.constant 0 : index
    %c0_5 = arith.constant 0 : index
    %10 = vector.load %arg2[%c0_4, %c0_5] : memref<8x1xi32, #tpu.memory_space<vmem>>, vector<8x1xi32>
    %11 = vector.broadcast %10 : vector<8x1xi32> to vector<8x128xi32>
    %12 = arith.cmpi eq, %9, %11 : vector<8x128xi32>
    %c16_i32 = arith.constant 16 : i32
    %13 = vector.broadcast %c16_i32 : i32 to vector<8x128xi32>
    %14 = arith.cmpi sge, %9, %13 : vector<8x128xi32>
    %15 = arith.ori %12, %14 : vector<8x128xi1>
    %cst_6 = arith.constant -1.000000e+30 : f32
    %16 = vector.broadcast %cst_6 : f32 to vector<8x128xf32>
    %17 = arith.select %15, %16, %5 : vector<8x128xi1>, vector<8x128xf32>
    %18 = arith.index_cast %arg1 : i32 to index
    %c0_7 = arith.constant 0 : index
    %c0_8 = arith.constant 0 : index
    %19 = vector.load %arg7[%18, %c0_7, %c0_8] : memref<1x8x1xf32, #tpu.memory_space<vmem>>, vector<1x8x1xf32>
    %20 = vector.shape_cast %19 : vector<1x8x1xf32> to vector<8x1xf32>
    %cst_9 = arith.constant dense<0xFF800000> : vector<8xf32>
    %21 = vector.multi_reduction <maximumf>, %17, %cst_9 [1] : vector<8x128xf32> to vector<8xf32>
    %22 = vector.shape_cast %21 : vector<8xf32> to vector<8x1xf32>
    %23 = arith.maximumf %20, %22 : vector<8x1xf32>
    %24 = arith.index_cast %arg1 : i32 to index
    %c0_10 = arith.constant 0 : index
    %c0_11 = arith.constant 0 : index
    %25 = vector.load %arg8[%24, %c0_10, %c0_11] : memref<1x8x1xf32, #tpu.memory_space<vmem>>, vector<1x8x1xf32>
    %26 = vector.shape_cast %25 : vector<1x8x1xf32> to vector<8x1xf32>
    %27 = arith.subf %20, %23 : vector<8x1xf32>
    %28 = math.exp %27 : vector<8x1xf32>
    %29 = arith.mulf %26, %28 : vector<8x1xf32>
    %30 = vector.broadcast %23 : vector<8x1xf32> to vector<8x128xf32>
    %31 = arith.subf %17, %30 : vector<8x128xf32>
    %32 = math.exp %31 : vector<8x128xf32>
    %cst_12 = arith.constant dense<0.000000e+00> : vector<8xf32>
    %33 = vector.multi_reduction <add>, %32, %cst_12 [1] : vector<8x128xf32> to vector<8xf32>
    %34 = vector.shape_cast %33 : vector<8xf32> to vector<8x1xf32>
    %35 = arith.addf %29, %34 : vector<8x1xf32>
    %36 = arith.index_cast %arg1 : i32 to index
    %c0_13 = arith.constant 0 : index
    %c0_14 = arith.constant 0 : index
    %37 = vector.load %arg7[%36, %c0_13, %c0_14] : memref<1x8x1xf32, #tpu.memory_space<vmem>>, vector<1x8x1xf32>
    %38 = vector.shape_cast %37 : vector<1x8x1xf32> to vector<8x1xf32>
    %39 = vector.shape_cast %23 : vector<8x1xf32> to vector<1x8x1xf32>
    tpu.vector_store %arg7[%36, %c0_13, %c0_14], %39 {strides = array<i32>} : memref<1x8x1xf32, #tpu.memory_space<vmem>>, vector<1x8x1xf32>,
    %40 = arith.index_cast %arg1 : i32 to index
    %c0_15 = arith.constant 0 : index
    %c0_16 = arith.constant 0 : index
    %41 = vector.load %arg8[%40, %c0_15, %c0_16] : memref<1x8x1xf32, #tpu.memory_space<vmem>>, vector<1x8x1xf32>
    %42 = vector.shape_cast %41 : vector<1x8x1xf32> to vector<8x1xf32>
    %43 = vector.shape_cast %35 : vector<8x1xf32> to vector<1x8x1xf32>
    tpu.vector_store %arg8[%40, %c0_15, %c0_16], %43 {strides = array<i32>} : memref<1x8x1xf32, #tpu.memory_space<vmem>>, vector<1x8x1xf32>,
    %c0_i32_17 = arith.constant 0 : i32
    %44 = arith.cmpi eq, %arg0, %c0_i32_17 : i32
    %45 = arith.extui %44 : i1 to i32
    %c0_i32_18 = arith.constant 0 : i32
    %46 = arith.cmpi ne, %45, %c0_i32_18 : i32
    scf.if %46 {
      %c0_19 = arith.constant 0 : index
      %c0_20 = arith.constant 0 : index
      %47 = vector.load %arg3[%c0_19, %c0_20] : memref<8x1xf32, #tpu.memory_space<vmem>>, vector<8x1xf32>
      %48 = arith.maximumf %23, %47 : vector<8x1xf32>
      %49 = arith.subf %23, %48 : vector<8x1xf32>
      %50 = math.exp %49 : vector<8x1xf32>
      %51 = arith.mulf %35, %50 : vector<8x1xf32>
      %52 = arith.subf %47, %48 : vector<8x1xf32>
      %53 = math.exp %52 : vector<8x1xf32>
      %54 = arith.addf %51, %53 : vector<8x1xf32>
      %55 = math.log %54 : vector<8x1xf32>
      %56 = arith.addf %48, %55 : vector<8x1xf32>
      %57 = arith.subf %56, %47 : vector<8x1xf32>
      %c0_21 = arith.constant 0 : index
      %c0_22 = arith.constant 0 : index
      %58 = vector.load %arg6[%c0_21, %c0_22] : memref<8x1xf32, #tpu.memory_space<vmem>>, vector<8x1xf32>
      tpu.vector_store %arg6[%c0_21, %c0_22], %57 {strides = array<i32>} : memref<8x1xf32, #tpu.memory_space<vmem>>, vector<8x1xf32>,
    } else {
    }
    return
  }
  func.func @transform_0(%arg0: i32, %arg1: i32) -> (i32, i32) {
    %c0_i32 = arith.constant 0 : i32
    %c0_i32_0 = arith.constant 0 : i32
    return %arg1, %c0_i32 : i32, i32
  }
  func.func @transform_1(%arg0: i32, %arg1: i32) -> (i32, i32) {
    %c0_i32 = arith.constant 0 : i32
    %c0_i32_0 = arith.constant 0 : i32
    return %arg1, %c0_i32 : i32, i32
  }
  func.func @transform_2(%arg0: i32, %arg1: i32) -> (i32, i32) {
    %c0_i32 = arith.constant 0 : i32
    %c0_i32_0 = arith.constant 0 : i32
    return %arg1, %c0_i32 : i32, i32
  }
  func.func @transform_3(%arg0: i32, %arg1: i32) -> (i32, i32) {
    %c0_i32 = arith.constant 0 : i32
    %c0_i32_0 = arith.constant 0 : i32
    return %arg0, %c0_i32 : i32, i32
  }
  func.func @transform_4(%arg0: i32, %arg1: i32) -> (i32, i32) {
    %c0_i32 = arith.constant 0 : i32
    %c0_i32_0 = arith.constant 0 : i32
    return %arg1, %c0_i32 : i32, i32
  }
}

</mosaic_0001>

<bundles_post_ra>
// kernel: angular_softmax_loss.1
= control target key start
LH: loop header
LB: loop body
LE: loop exit
PB: predicated region body
PF: predicated region fallthrough
CT: control target
= control target key end

     0   :  { %v221_v6 = vmov 0   ;;  %vm23_vm0 = vcmask 7168   ;;  %v222_v11 = vmov -1e+30   ;;  %v106_v12 = vlaneseq  ;;  %s290_s3 = inlined_call_operand.vmem [shape: bf16[128,128], index: 3, kind: input, shape index: {}]   ;;  %s291_s0 = inlined_call_operand.vmem [shape: s32[8,1], index: 0, kind: input, shape index: {}]   ;;  %s292_s2 = inlined_call_operand.vmem [shape: bf16[8,128], index: 2, kind: input, shape index: {}]   ;;  %s293_s1 = inlined_call_operand.vmem [shape: f32[8,1], index: 1, kind: input, shape index: {}]   ;;  %s294_s4 = inlined_call_operand.vmem [shape: f32[8,1], index: 4, kind: output, shape index: {}]  }
   0x1   :  { %v205_v0 = vld [vmem:[%s290_s3 + $0x38] sm:$0xff]  ;;  %v204_v1 = vld [vmem:[%s290_s3 + $0x30] sm:$0xff]  ;;  %v203_v2 = vld [vmem:[%s290_s3 + $0x28] sm:$0xff]  ;;  %209 = vset.pattern.permute.xlu0 %v221_v6  ;;  %210 = vset.pattern.permute.xlu1 %v221_v6  ;;  %24 = vst.msk [vmem:[#allocation2] sm:$0xff] %vm23_vm0, %v222_v11  ;;  %v223_v18 = vmov 0.0  }
   0x2   :  { %92 = vmatpush.bf16.xpose.msra.mxu0 %v205_v0  ;;  %v202_v3 = vld [vmem:[%s290_s3 + $0x20] sm:$0xff]  ;;  %v201_v4 = vld [vmem:[%s290_s3 + $0x18] sm:$0xff]  ;;  %v200_v7 = vld [vmem:[%s290_s3 + $0x10] sm:$0xff]  ;;  %v107_v13 = vand.u32 127, %v106_v12  ;;  %26 = vst.msk [vmem:[#allocation3] sm:$0xff] %vm23_vm0, %v223_v18 }
   0x3   :  { %v110_v5 = vld [vmem:[%s291_s0] sm:$0xff]  ;;  %v199_v8 = vld [vmem:[%s290_s3 + $0x8] sm:$0xff] }
   0x4   :  { %112 = vperm.xlu0 %209, %v110_v5   ;;  %v198_v9 = vld [vmem:[%s290_s3] sm:$0xff]  ;;  %vm115_vm2 = vcmp.ge.s32.totalorder %v107_v13, 16 }
   0x5   :  { %v27_v10 = vld [vmem:[%s292_s2] sm:$0xf] }
   0x6   :  { %v147_v27 = vld [vmem:[%s293_s1] sm:$0xff] }
   0x8   :  { %v120_v19 = vld [vmem:[#allocation2] sm:$0xff] }
   0x9   :  { %v125_v35 = vld [vmem:[#allocation3] sm:$0xff] }
   0xa   :  { %93 = vmatpush.bf16.xpose.msra.mxu0 %v204_v1 }
  0x12   :  { %94 = vmatpush.bf16.xpose.msra.mxu0 %v203_v2 }
  0x1a   :  { %95 = vmatpush.bf16.xpose.msra.mxu0 %v202_v3 }
  0x22   :  { %96 = vmatpush.bf16.xpose.msra.mxu0 %v201_v4 }
  0x2a   :  { %97 = vmatpush.bf16.xpose.msra.mxu0 %v200_v7 }
  0x32   :  { %98 = vmatpush.bf16.xpose.msra.mxu0 %v199_v8 }
  0x3a   :  { %99 = vmatpush.bf16.xpose.msra.mxu0 %v198_v9 }
  0x41   :  { %100 = vmatmul.bf16.vlgmr.msra.gmra.mxu0 %v27_v10 }
  0x76   :  { %v113_v14 = vpop.permute.xlu0 %112 }
  0x77   :  { %vm114_vm1 = vcmp.eq.s32.totalorder %v107_v13, %v113_v14 }
  0x78   :  { %vm116_vm3 = vmor %vm114_vm1, %vm115_vm2 }
  0xbe   :  { %v101_v15 = vpop.f32.mrf.mxu0 }
  0xbf   :  { %v117_v16 = vsel %vm116_vm3, -1e+30, %v101_v15 }
  0xc0   :  { %121 = vmax.xlane.f32.xlu0 %v117_v16 }
  0xc6   :  { %v103_v17 = vpop.f32.mrf.mxu0 }
 0x133   :  { %v122_v20 = vpop.xlane.xlu0 %121 }
 0x134   :  { %v123_v21 = vmax.f32 %v120_v19, %v122_v20 }
 0x136   :  { %v126_v22 = vsub.f32 %v120_v19, %v123_v21  ;;  %142 = vst.msk [vmem:[#allocation2] sm:$0xff] %vm23_vm0, %v123_v21  ;;  %132 = vperm.xlu1 %210, %v123_v21   ;;  %v148_v28 = vmax.f32 %v123_v21, %v147_v27 }
 0x138   :  { %v127_v29 = vmul.f32 1.442695, %v126_v22  ;;  %v149_v30 = vsub.f32 %v123_v21, %v148_v28  ;;  %v153_v31 = vsub.f32 %v147_v27, %v148_v28 }
 0x13a   :  { %v150_v32 = vmul.f32 1.442695, %v149_v30  ;;  %v154_v33 = vmul.f32 1.442695, %v153_v31 }
 0x1a8   :  { %v133_v23 = vpop.permute.xlu1 %132 }
 0x1a9   :  { %v135_v24 = vsub.f32 %v117_v16, %v133_v23 }
 0x1ab   :  { %v136_v25 = vmul.f32 1.442695, %v135_v24 }
 0x1ad   :  { %211 = vpow2.f32 %v136_v25 }
 0x1ae   :  { %213 = vpow2.f32 %v127_v29 }
 0x1af   :  { %215 = vpow2.f32 %v150_v32 }
 0x1b0   :  { %217 = vpow2.f32 %v154_v33 }
 0x1b3   :  { %v212_v26 = vpop.eup %211 }
 0x1b4   :  { %138 = vadd.xlane.f32.xlu1 %v212_v26  ;;  %v214_v34 = vpop.eup %213 }
 0x1b5   :  { %v129_v36 = vmul.f32 %v214_v34, %v125_v35  ;;  %v216_v39 = vpop.eup %215 }
 0x1b6   :  { %v218_v41 = vpop.eup %217 }
 0x227   :  { %v139_v37 = vpop.xlane.xlu1 %138 }
 0x228   :  { %v140_v38 = vadd.f32 %v139_v37, %v129_v36 }
 0x22a   :  { %143 = vst.msk [vmem:[#allocation3] sm:$0xff] %vm23_vm0, %v140_v38  ;;  %v152_v40 = vmul.f32 %v216_v39, %v140_v38 }
 0x22c   :  { %v156_v42 = vadd.f32 %v218_v41, %v152_v40 }
 0x22e   :  { %219 = vlog2.f32 %v156_v42 }
 0x234   :  { %v220_v43 = vpop.eup %219 }
 0x235   :  { %v158_v44 = vmul.f32 0.6931472, %v220_v43 }
 0x237   :  { %v159_v45 = vadd.f32 %v158_v44, %v148_v28 }
 0x239   :  { %v160_v46 = vsub.f32 %v159_v45, %v147_v27 }
 0x23b   :  { %161 = vst.msk [vmem:[%s294_s4] sm:$0xff] %vm23_vm0, %v160_v46 }

</bundles_post_ra>
